<compile_context>
chip_gen: v7x
topology: tpu7x:2x2x1
jax: 0.10.0
libtpu: 0.0.40
codegen_flags: <defaults>
</compile_context>

<pallas_src>
import math

import jax
import jax.numpy as jnp
from jax.experimental import pallas as pl
from jax.experimental.pallas import tpu as pltpu

LANE = 128  # pad final output features to a full lane width


# ---------------------------------------------------------------------------
# Kernel
# ---------------------------------------------------------------------------
def _gcn_fused_kernel(a_ref, x_ref, w1_ref, b1_ref, w2_ref, b2_ref, w3_ref, b3_ref,
                      h_ref, clone_ref):
    """h = sigmoid(L3(relu(L2(relu(L1(x)))))); clone = (z3 >= 0) ? 1 : 0,
    with Lk(h) = A_hat @ (h @ Wk) + bk, all matmuls bf16-in / f32-accumulate."""
    a = a_ref[...]          # bf16 (N, N), stays resident in VMEM across all 3 layers
    x = x_ref[...]          # bf16 (N, F_in)

    def layer(h, w_ref, b_ref):
        hw = jnp.dot(h, w_ref[...], preferred_element_type=jnp.float32)        # (N, F_out) f32
        z = jnp.dot(a, hw.astype(jnp.bfloat16), preferred_element_type=jnp.float32)
        return z + b_ref[...]                                                   # f32

    h1 = jnp.maximum(layer(x, w1_ref, b1_ref), 0.0).astype(jnp.bfloat16)
    h2 = jnp.maximum(layer(h1, w2_ref, b2_ref), 0.0).astype(jnp.bfloat16)
    z3 = layer(h2, w3_ref, b3_ref)                                              # (N, LANE) f32

    h_ref[...] = jax.nn.sigmoid(z3).astype(h_ref.dtype)
    # sigmoid is monotone with sigmoid(0) = 0.5, so z >= 0  <=>  sigmoid(z) >= 0.5.
    # VPU compare/select issues independently of the EUP sigmoid above.
    clone_ref[...] = jnp.where(z3 >= 0.0, 1.0, 0.0).astype(clone_ref.dtype)


# ---------------------------------------------------------------------------
# Wrapper
# ---------------------------------------------------------------------------
def _vmem_spec():
    return pl.BlockSpec(memory_space=pltpu.MemorySpace.VMEM)


@jax.jit
def gcn_forward(a_hat, in_feat, params):
    (w1, b1), (w2, b2), (w3, b3) = params
    n = in_feat.shape[0]
    h_feats = w3.shape[1]

    # Lane-dense final layer: zero-pad W3 / b3 to LANE output features; slice after the call.
    w3p = jnp.zeros((w3.shape[0], LANE), jnp.float32).at[:, :h_feats].set(w3)
    b3p = jnp.zeros((LANE,), jnp.float32).at[:h_feats].set(b3)

    args = (
        a_hat.astype(jnp.bfloat16),
        in_feat.astype(jnp.bfloat16),
        w1.astype(jnp.bfloat16), b1.reshape(1, -1).astype(jnp.float32),
        w2.astype(jnp.bfloat16), b2.reshape(1, -1).astype(jnp.float32),
        w3p.astype(jnp.bfloat16), b3p.reshape(1, -1),
    )

    h_pad, clone_pad = pl.pallas_call(
        _gcn_fused_kernel,
        out_shape=(
            jax.ShapeDtypeStruct((n, LANE), jnp.float32),
            jax.ShapeDtypeStruct((n, LANE), jnp.float32),
        ),
        in_specs=[_vmem_spec() for _ in range(8)],
        out_specs=(_vmem_spec(), _vmem_spec()),
    )(*args)

    return h_pad[:, :h_feats], clone_pad[:, :h_feats]


# ---------------------------------------------------------------------------
# Deterministic parameter / graph construction
# ---------------------------------------------------------------------------
def make_params(key, in_feats, h_feats):
    hidden_feats = math.floor((h_feats + in_feats) / 2)
    dims = [(in_feats, hidden_feats), (hidden_feats, hidden_feats), (hidden_feats, h_feats)]
    params = []
    for fin, fout in dims:
        kw, key = jax.random.split(key)
        limit = math.sqrt(6.0 / (fin + fout))  # Glorot-uniform like DGL GraphConv; bias zeros.
        w = jax.random.uniform(kw, (fin, fout), jnp.float32, -limit, limit)
        b = jnp.zeros((fout,), jnp.float32)
        params.append((w, b))
    return params


def make_graph(key, n_nodes):
    # Random symmetric adjacency with self-loops, then symmetric normalization.
    a = (jax.random.uniform(key, (n_nodes, n_nodes)) < 0.3).astype(jnp.float32)
    a = jnp.maximum(a, a.T)
    a = jnp.maximum(a, jnp.eye(n_nodes, dtype=jnp.float32))
    deg = jnp.sum(a, axis=1)
    d_inv_sqrt = 1.0 / jnp.sqrt(deg)
    return d_inv_sqrt[:, None] * a * d_inv_sqrt[None, :]


# ---------------------------------------------------------------------------
# Main
# ---------------------------------------------------------------------------
if __name__ == "__main__":
    N_NODES = 16
    IN_FEATS = 16
    H_FEATS = 8  # hidden_feats = floor((8+16)/2) = 12

    key = jax.random.PRNGKey(0)
    k_graph, k_feat, k_param = jax.random.split(key, 3)

    a_hat = make_graph(k_graph, N_NODES)                                    # (16, 16)
    in_feat = jax.random.normal(k_feat, (N_NODES, IN_FEATS), jnp.float32)   # (16, 16)
    params = make_params(k_param, IN_FEATS, H_FEATS)

    h, h_clone = gcn_forward(a_hat, in_feat, params)
    jax.block_until_ready((h, h_clone))

    # Pure-JAX f32 reference.
    def ref(a, x, ps):
        (w1, b1), (w2, b2), (w3, b3) = ps
        r = jnp.maximum(a @ x @ w1 + b1, 0.0)
        r = jnp.maximum(a @ r @ w2 + b2, 0.0)
        r = jax.nn.sigmoid(a @ r @ w3 + b3)
        return r, jnp.where(r >= 0.5, 1.0, 0.0)

    h_ref, c_ref = ref(a_hat, in_feat, params)

    # bf16 MXU operands -> loosened tolerance on h; clone checked away from the 0.5 boundary
    # (values at the boundary can legitimately flip under bf16 rounding) plus binary-ness.
    assert jnp.allclose(h, h_ref, atol=5e-2), "h mismatch"
    away = jnp.abs(h_ref - 0.5) > 3e-2
    assert bool(jnp.all(jnp.where(away, h_clone == c_ref, True))), "h_clone mismatch"
    assert bool(jnp.all((h_clone == 0.0) | (h_clone == 1.0))), "h_clone not binary"

    print("KERNEL_OK")
</pallas_src>

<mosaic_0001>
module attributes {stable_mosaic.version = 11 : i64} {
  func.func @_gcn_fused_kernel(%arg0: memref<16x16xbf16, #tpu.memory_space<vmem>>, %arg1: memref<16x16xbf16, #tpu.memory_space<vmem>>, %arg2: memref<16x12xbf16, #tpu.memory_space<vmem>>, %arg3: memref<1x12xf32, #tpu.memory_space<vmem>>, %arg4: memref<12x12xbf16, #tpu.memory_space<vmem>>, %arg5: memref<1x12xf32, #tpu.memory_space<vmem>>, %arg6: memref<12x128xbf16, #tpu.memory_space<vmem>>, %arg7: memref<1x128xf32, #tpu.memory_space<vmem>>, %arg8: memref<16x128xf32, #tpu.memory_space<vmem>>, %arg9: memref<16x128xf32, #tpu.memory_space<vmem>>) attributes {dimension_semantics = [], scalar_prefetch = 0 : i64, scratch_operands = 0 : i64, tpu.core_type = #tpu.core_type<tc>} {
    %c0 = arith.constant 0 : index
    %c0_0 = arith.constant 0 : index
    %0 = vector.load %arg0[%c0, %c0_0] : memref<16x16xbf16, #tpu.memory_space<vmem>>, vector<16x16xbf16>
    %c0_1 = arith.constant 0 : index
    %c0_2 = arith.constant 0 : index
    %1 = vector.load %arg1[%c0_1, %c0_2] : memref<16x16xbf16, #tpu.memory_space<vmem>>, vector<16x16xbf16>
    %c0_3 = arith.constant 0 : index
    %c0_4 = arith.constant 0 : index
    %2 = vector.load %arg2[%c0_3, %c0_4] : memref<16x12xbf16, #tpu.memory_space<vmem>>, vector<16x12xbf16>
    %cst = arith.constant dense<0.000000e+00> : vector<16x12xf32>
    %3 = tpu.matmul %1, %2, %cst {dimension_numbers = #tpu.dot_dimension_numbers<[1], [0], [0], [1], [0, 0, 1, 1], [], []>} : vector<16x16xbf16>, vector<16x12xbf16>, vector<16x12xf32> -> vector<16x12xf32>
    %4 = arith.truncf %3 : vector<16x12xf32> to vector<16x12xbf16>
    %cst_5 = arith.constant dense<0.000000e+00> : vector<16x12xf32>
    %5 = tpu.matmul %0, %4, %cst_5 {dimension_numbers = #tpu.dot_dimension_numbers<[1], [0], [0], [1], [0, 0, 1, 1], [], []>} : vector<16x16xbf16>, vector<16x12xbf16>, vector<16x12xf32> -> vector<16x12xf32>
    %c0_6 = arith.constant 0 : index
    %c0_7 = arith.constant 0 : index
    %6 = vector.load %arg3[%c0_6, %c0_7] : memref<1x12xf32, #tpu.memory_space<vmem>>, vector<1x12xf32>
    %7 = vector.broadcast %6 : vector<1x12xf32> to vector<16x12xf32>
    %8 = arith.addf %5, %7 : vector<16x12xf32>
    %cst_8 = arith.constant 0.000000e+00 : f32
    %9 = vector.broadcast %cst_8 : f32 to vector<16x12xf32>
    %10 = arith.maximumf %8, %9 : vector<16x12xf32>
    %11 = arith.truncf %10 : vector<16x12xf32> to vector<16x12xbf16>
    %c0_9 = arith.constant 0 : index
    %c0_10 = arith.constant 0 : index
    %12 = vector.load %arg4[%c0_9, %c0_10] : memref<12x12xbf16, #tpu.memory_space<vmem>>, vector<12x12xbf16>
    %cst_11 = arith.constant dense<0.000000e+00> : vector<16x12xf32>
    %13 = tpu.matmul %11, %12, %cst_11 {dimension_numbers = #tpu.dot_dimension_numbers<[1], [0], [0], [1], [0, 0, 1, 1], [], []>} : vector<16x12xbf16>, vector<12x12xbf16>, vector<16x12xf32> -> vector<16x12xf32>
    %14 = arith.truncf %13 : vector<16x12xf32> to vector<16x12xbf16>
    %cst_12 = arith.constant dense<0.000000e+00> : vector<16x12xf32>
    %15 = tpu.matmul %0, %14, %cst_12 {dimension_numbers = #tpu.dot_dimension_numbers<[1], [0], [0], [1], [0, 0, 1, 1], [], []>} : vector<16x16xbf16>, vector<16x12xbf16>, vector<16x12xf32> -> vector<16x12xf32>
    %c0_13 = arith.constant 0 : index
    %c0_14 = arith.constant 0 : index
    %16 = vector.load %arg5[%c0_13, %c0_14] : memref<1x12xf32, #tpu.memory_space<vmem>>, vector<1x12xf32>
    %17 = vector.broadcast %16 : vector<1x12xf32> to vector<16x12xf32>
    %18 = arith.addf %15, %17 : vector<16x12xf32>
    %cst_15 = arith.constant 0.000000e+00 : f32
    %19 = vector.broadcast %cst_15 : f32 to vector<16x12xf32>
    %20 = arith.maximumf %18, %19 : vector<16x12xf32>
    %21 = arith.truncf %20 : vector<16x12xf32> to vector<16x12xbf16>
    %c0_16 = arith.constant 0 : index
    %c0_17 = arith.constant 0 : index
    %22 = vector.load %arg6[%c0_16, %c0_17] : memref<12x128xbf16, #tpu.memory_space<vmem>>, vector<12x128xbf16>
    %cst_18 = arith.constant dense<0.000000e+00> : vector<16x128xf32>
    %23 = tpu.matmul %21, %22, %cst_18 {dimension_numbers = #tpu.dot_dimension_numbers<[1], [0], [0], [1], [0, 0, 1, 1], [], []>} : vector<16x12xbf16>, vector<12x128xbf16>, vector<16x128xf32> -> vector<16x128xf32>
    %24 = arith.truncf %23 : vector<16x128xf32> to vector<16x128xbf16>
    %cst_19 = arith.constant dense<0.000000e+00> : vector<16x128xf32>
    %25 = tpu.matmul %0, %24, %cst_19 {dimension_numbers = #tpu.dot_dimension_numbers<[1], [0], [0], [1], [0, 0, 1, 1], [], []>} : vector<16x16xbf16>, vector<16x128xbf16>, vector<16x128xf32> -> vector<16x128xf32>
    %c0_20 = arith.constant 0 : index
    %c0_21 = arith.constant 0 : index
    %26 = vector.load %arg7[%c0_20, %c0_21] : memref<1x128xf32, #tpu.memory_space<vmem>>, vector<1x128xf32>
    %27 = vector.broadcast %26 : vector<1x128xf32> to vector<16x128xf32>
    %28 = arith.addf %25, %27 : vector<16x128xf32>
    %29 = arith.negf %28 : vector<16x128xf32>
    %30 = math.exp %29 : vector<16x128xf32>
    %cst_22 = arith.constant 1.000000e+00 : f32
    %31 = vector.broadcast %cst_22 : f32 to vector<16x128xf32>
    %32 = arith.addf %31, %30 : vector<16x128xf32>
    %33 = arith.divf %31, %32 : vector<16x128xf32>
    %c0_23 = arith.constant 0 : index
    %c0_24 = arith.constant 0 : index
    %34 = vector.load %arg8[%c0_23, %c0_24] : memref<16x128xf32, #tpu.memory_space<vmem>>, vector<16x128xf32>
    tpu.vector_store %arg8[%c0_23, %c0_24], %33 {strides = array<i32>} : memref<16x128xf32, #tpu.memory_space<vmem>>, vector<16x128xf32>,
    %cst_25 = arith.constant 0.000000e+00 : f32
    %35 = vector.broadcast %cst_25 : f32 to vector<16x128xf32>
    %36 = arith.cmpf oge, %28, %35 : vector<16x128xf32>
    %cst_26 = arith.constant 1.000000e+00 : f32
    %cst_27 = arith.constant 0.000000e+00 : f32
    %37 = vector.broadcast %cst_26 : f32 to vector<16x128xf32>
    %38 = vector.broadcast %cst_27 : f32 to vector<16x128xf32>
    %39 = arith.select %36, %37, %38 : vector<16x128xi1>, vector<16x128xf32>
    %c0_28 = arith.constant 0 : index
    %c0_29 = arith.constant 0 : index
    %40 = vector.load %arg9[%c0_28, %c0_29] : memref<16x128xf32, #tpu.memory_space<vmem>>, vector<16x128xf32>
    tpu.vector_store %arg9[%c0_28, %c0_29], %39 {strides = array<i32>} : memref<16x128xf32, #tpu.memory_space<vmem>>, vector<16x128xf32>,
    return
  }
}

</mosaic_0001>

<bundles_post_ra>
// kernel: gcn_forward.1
= control target key start
LH: loop header
LB: loop body
LE: loop exit
PB: predicated region body
PF: predicated region fallthrough
CT: control target
= control target key end

     0   :  { %v472_v0 = vmov 0.0   ;;  %vm473_vm0 = vmmov 0   ;;  %vm49_vm1 = vcmask 130048   ;;  %vm165_vm2 = vcmask 1045504   ;;  %s588_s2 = inlined_call_operand.vmem [shape: bf16[16,12], index: 2, kind: input, shape index: {}]   ;;  %s589_s1 = inlined_call_operand.vmem [shape: bf16[16,16], index: 1, kind: input, shape index: {}]   ;;  %s590_s0 = inlined_call_operand.vmem [shape: bf16[16,16], index: 0, kind: input, shape index: {}]   ;;  %s591_s4 = inlined_call_operand.vmem [shape: bf16[12,12], index: 4, kind: input, shape index: {}]   ;;  %s592_s3 = inlined_call_operand.vmem [shape: f32[1,12], index: 3, kind: input, shape index: {}]   ;;  %s593_s6 = inlined_call_operand.vmem [shape: bf16[12,128], index: 6, kind: input, shape index: {}]   ;;  %s594_s5 = inlined_call_operand.vmem [shape: f32[1,12], index: 5, kind: input, shape index: {}]   ;;  %s595_s7 = inlined_call_operand.vmem [shape: f32[1,128], index: 7, kind: input, shape index: {}]   ;;  %s596_s9 = inlined_call_operand.vmem [shape: f32[16,128], index: 9, kind: output, shape index: {1}]   ;;  %s597_s8 = inlined_call_operand.vmem [shape: f32[16,128], index: 8, kind: output, shape index: {0}]  }
   0x1   :  { %421 = vmatprep.subr.bf16.mxu0 %v472_v0  ;;  %v459_v1 = vld [vmem:[%s588_s2] sm:$0xff]   ;;  %423 = vmatprep.mubr.msk.bf16.mxu0 %vm473_vm0, %v472_v0  ;;  %vm161_vm3 = vcmask 97280  }
   0x2   :  { %v460_v2 = vld [vmem:[%s589_s1] sm:$0xff]   ;;  %427 = vmatprep.subr.bf16.mxu1 %v472_v0  ;;  %429 = vmatprep.mubr.msk.bf16.mxu1 %vm473_vm0, %v472_v0 }
   0x3   :  { %422 = vmatpush3.bf16.msra.mxu0 %v459_v1  ;;  %v461_v8 = vld [vmem:[%s590_s0] sm:$0xff]  }
   0x4   :  { %433 = vmatprep.subr.bf16.mxu0 %v472_v0  ;;  %v462_v9 = vld [vmem:[%s591_s4] sm:$0x3f]  }
   0x5   :  { %v167_v10 = vsel %vm165_vm2, %v462_v9, 0  ;;  %v396_v11 = vld [vmem:[%s592_s3] ss:$0 sm:$0xff] }
   0x6   :  { %424 = vmatmul.mubr.msk.bf16.vlgmr.msra.gmra.mrb[0].mxu0 %vm49_vm1, %v460_v2  ;;  %v463_v26 = vld [vmem:[%s593_s6] sm:$0x3f]  }
   0x7   :  { %435 = vmatprep.mubr.msk.bf16.mxu0 %vm473_vm0, %v472_v0  ;;  %434 = vmatpush3.bf16.msra.mxu0 %v167_v10  ;;  %v273_v27 = vsel %vm165_vm2, %v463_v26, 0  ;;  %v401_v28 = vld [vmem:[%s594_s5] ss:$0 sm:$0xff] }
   0x8   :  { %445 = vmatprep.subr.bf16.mxu0 %v472_v0  ;;  %v405_v43 = vld [vmem:[%s595_s7] ss:$0 sm:$0xff] }
  0xd9   :  { %v87_v3 = vpop.f32.mrb[0].mxu0 }
  0xda   :  { %v425_v4 = vpop.f32.mrb[1].mxu0 }
  0xdb   :  { %v90_v5 = vpop.f32.mrb[2].mxu0 }
  0xdc   :  { %v94_v6 = vpack.c.bf16 %v90_v5, %v87_v3  ;;  %v426_v7 = vpop.f32.mrb[3].mxu0 }
  0xde   :  { %428 = vmatpush3.bf16.msra.mxu1 %v94_v6 }
  0xdf   :  { %439 = vmatprep.subr.bf16.mxu1 %v472_v0 }
  0xe1   :  { %430 = vmatmul.mubr.msk.bf16.vlgmr.msra.gmra.mrb[0].mxu1 %vm49_vm1, %v461_v8 }
  0xe2   :  { %441 = vmatprep.mubr.msk.bf16.mxu1 %vm473_vm0, %v472_v0 }
 0x1b4   :  { %v144_v12 = vpop.f32.mrb[0].mxu1 }
 0x1b5   :  { %v145_v13 = vadd.f32 %v396_v11, %v144_v12  ;;  %v431_v14 = vpop.f32.mrb[1].mxu1 }
 0x1b6   :  { %v147_v15 = vpop.f32.mrb[2].mxu1 }
 0x1b7   :  { %v148_v16 = vadd.f32 %v396_v11, %v147_v15  ;;  %v432_v17 = vpop.f32.mrb[3].mxu1  ;;  %v151_v18 = vmax.f32 %v145_v13, 0.0 }
 0x1b9   :  { %v152_v19 = vmax.f32 %v148_v16, 0.0 }
 0x1bb   :  { %v153_v20 = vpack.c.bf16 %v152_v19, %v151_v18 }
 0x1bd   :  { %436 = vmatmul.mubr.msk.bf16.vlgmr.msra.gmra.mrb[4].mxu0 %vm161_vm3, %v153_v20 }
 0x1be   :  { %447 = vmatprep.mubr.msk.bf16.mxu0 %vm473_vm0, %v472_v0  ;;  %446 = vmatpush3.bf16.msra.mxu0 %v273_v27 }
 0x290   :  { %v203_v21 = vpop.f32.mrb[4].mxu0 }
 0x291   :  { %v437_v22 = vpop.f32.mrb[5].mxu0 }
 0x292   :  { %v206_v23 = vpop.f32.mrb[6].mxu0 }
 0x293   :  { %v210_v24 = vpack.c.bf16 %v206_v23, %v203_v21  ;;  %v438_v25 = vpop.f32.mrb[7].mxu0 }
 0x295   :  { %440 = vmatpush3.bf16.msra.mxu1 %v210_v24 }
 0x296   :  { %451 = vmatprep.subr.bf16.mxu1 %v472_v0 }
 0x298   :  { %442 = vmatmul.mubr.msk.bf16.vlgmr.msra.gmra.mrb[4].mxu1 %vm49_vm1, %v461_v8 }
 0x299   :  { %453 = vmatprep.mubr.msk.bf16.mxu1 %vm473_vm0, %v472_v0 }
 0x36b   :  { %v252_v29 = vpop.f32.mrb[4].mxu1 }
 0x36c   :  { %v253_v30 = vadd.f32 %v401_v28, %v252_v29  ;;  %v443_v31 = vpop.f32.mrb[5].mxu1 }
 0x36d   :  { %v255_v32 = vpop.f32.mrb[6].mxu1 }
 0x36e   :  { %v256_v33 = vadd.f32 %v401_v28, %v255_v32  ;;  %v444_v34 = vpop.f32.mrb[7].mxu1  ;;  %v259_v35 = vmax.f32 %v253_v30, 0.0 }
 0x370   :  { %v260_v36 = vmax.f32 %v256_v33, 0.0 }
 0x372   :  { %v261_v37 = vpack.c.bf16 %v260_v36, %v259_v35 }
 0x374   :  { %448 = vmatmul.mubr.msk.bf16.vlgmr.msra.gmra.mrb[8].mxu0 %vm161_vm3, %v261_v37 }
 0x447   :  { %v309_v38 = vpop.f32.mrb[8].mxu0 }
 0x448   :  { %v449_v39 = vpop.f32.mrb[9].mxu0 }
 0x449   :  { %v312_v40 = vpop.f32.mrb[10].mxu0 }
 0x44a   :  { %v316_v41 = vpack.c.bf16 %v312_v40, %v309_v38  ;;  %v450_v42 = vpop.f32.mrb[11].mxu0 }
 0x44c   :  { %452 = vmatpush3.bf16.msra.mxu1 %v316_v41 }
 0x44f   :  { %454 = vmatmul.mubr.msk.bf16.vlgmr.msra.gmra.mrb[8].mxu1 %vm49_vm1, %v461_v8 }
 0x522   :  { %v358_v44 = vpop.f32.mrb[8].mxu1 }
 0x523   :  { %v359_v45 = vadd.f32 %v405_v43, %v358_v44  ;;  %v455_v46 = vpop.f32.mrb[9].mxu1 }
 0x524   :  { %v361_v47 = vpop.f32.mrb[10].mxu1 }
 0x525   :  { %v407_v48 = vmul.f32 -1.442695, %v359_v45  ;;  %vm379_vm4 = vcmp.ge.f32.partialorder %v359_v45, 0.0  ;;  %v362_v49 = vadd.f32 %v405_v43, %v361_v47  ;;  %v456_v50 = vpop.f32.mrb[11].mxu1 }
 0x526   :  { %v381_v51 = vsel %vm379_vm4, 1.0, %v472_v0 }
 0x527   :  { %464 = vpow2.f32 %v407_v48  ;;  %383 = vst [vmem:[%s596_s9] sm:$0xff] %v381_v51  ;;  %v408_v52 = vmul.f32 -1.442695, %v362_v49  ;;  %vm380_vm5 = vcmp.ge.f32.partialorder %v362_v49, 0.0 }
 0x528   :  { %v382_v53 = vsel %vm380_vm5, 1.0, %v472_v0 }
 0x529   :  { %466 = vpow2.f32 %v408_v52  ;;  %384 = vst [vmem:[%s596_s9 + $0x8] sm:$0xff] %v382_v53 }
 0x531   :  { %v465_v54 = vpop.eup %464 }
 0x532   :  { %v371_v55 = vadd.f32 1.0, %v465_v54 }
 0x533   :  { %v467_v56 = vpop.eup %466 }
 0x534   :  { %468 = vrcp.f32 %v371_v55  ;;  %v372_v57 = vadd.f32 1.0, %v467_v56 }
 0x536   :  { %470 = vrcp.f32 %v372_v57 }
 0x53e   :  { %v469_v58 = vpop.eup %468 }
 0x53f   :  { %377 = vst [vmem:[%s597_s8] sm:$0xff] %v469_v58 }
 0x540   :  { %v471_v59 = vpop.eup %470 }
 0x541   :  { %378 = vst [vmem:[%s597_s8 + $0x8] sm:$0xff] %v471_v59 }

</bundles_post_ra>
